<compile_context>
chip_gen: v5e
topology: v5e:2x2
jax: 0.10.0
libtpu: 0.0.40
codegen_flags: <defaults>
</compile_context>

<pallas_src>
import math
import functools

import jax
import jax.numpy as jnp
from jax.experimental import pallas as pl
from jax.experimental.pallas import tpu as pltpu


def _attn_kernel(vl_ref, q_ref, k_ref, v_ref, o_ref, *, masked):
    """One grid step = one block of heads, K/V fully resident.

    vl_ref: [Hblk, Lq] int32 per-(head, query) valid lengths.
    q_ref : [Hblk, Lq, D],  k_ref/v_ref: [Hblk, Lk, D],  o_ref: [Hblk, Lq, D].
    """
    q = q_ref[...]
    k = k_ref[...]
    v = v_ref[...]
    d = q.shape[-1]

    # Fold 1/sqrt(d) into Q (Hblk*Lq*D multiplies instead of Hblk*Lq*Lk).
    q = q * jnp.asarray(1.0 / math.sqrt(d), q.dtype)

    # scores = Q K^T -> [Hblk, Lq, Lk]; contract over D directly (no explicit
    # transpose of K), f32 MXU accumulation.
    scores = jnp.einsum("hqd,hkd->hqk", q, k,
                        preferred_element_type=jnp.float32)

    if masked:
        # key index >= valid_len  ->  -1e6   (matches torch masked_fill).
        vl = vl_ref[...]                                     # [Hblk, Lq] int32
        col = jax.lax.broadcasted_iota(jnp.int32, scores.shape, 2)
        scores = jnp.where(col >= vl[:, :, None],
                           jnp.float32(-1000000.0), scores)

    # Numerically stable softmax over keys; exact f32 division (the approx
    # reciprocal was the source of the previous numerical mismatch).
    m = jnp.max(scores, axis=-1, keepdims=True)
    e = jnp.exp(scores - m)
    p = (e / jnp.sum(e, axis=-1, keepdims=True)).astype(v.dtype)

    # P @ V: one batched matmul, one full-block store in [Hblk, Lq, D] layout.
    out = jnp.einsum("hqk,hkd->hqd", p, v, preferred_element_type=jnp.float32)
    o_ref[...] = out.astype(o_ref.dtype)


def _pick_block_heads(bh, lq, lk, d, dtype, vmem_budget_bytes=8 << 20):
    """Largest divisor of BH whose double-buffered block fits the budget."""
    itemsize = jnp.dtype(dtype).itemsize
    per_head = itemsize * (2 * lq * d + 2 * lk * d) + 4 * lq  # q,o,k,v + vlens
    best = 1
    for h in range(1, bh + 1):
        if bh % h == 0 and 2 * h * per_head <= vmem_budget_bytes:
            best = h
    return best


@functools.partial(jax.jit, static_argnames=("block_heads", "masked"))
def _dot_product_attention(vl_per_head, queries, keys, values, *,
                           block_heads, masked):
    """vl_per_head: [BH, Lq] int32; queries/keys/values: [BH, L, D]."""
    BH, Lq, D = queries.shape
    Lk = keys.shape[1]
    G = BH // block_heads
    assert G * block_heads == BH, "block_heads must divide batch*heads"

    itemsize = jnp.dtype(queries.dtype).itemsize
    cost = pl.CostEstimate(
        flops=4 * BH * Lq * Lk * D,
        transcendentals=BH * Lq * Lk,
        bytes_accessed=itemsize * (queries.size + keys.size + values.size
                                   + BH * Lq * D) + 4 * BH * Lq,
    )

    # Explicit scoped-VMEM request: double-buffered block footprint plus
    # headroom, capped well under v7x's 64 MiB physical VMEM.
    step_bytes = (itemsize * block_heads * (2 * Lq * D + 2 * Lk * D)
                  + 4 * block_heads * Lq)
    vmem_limit = int(min(max(4 * step_bytes + (4 << 20), 16 << 20), 48 << 20))

    grid_spec = pltpu.PrefetchScalarGridSpec(
        num_scalar_prefetch=0,
        grid=(G,),
        in_specs=[
            pl.BlockSpec((block_heads, Lq), lambda g: (g, 0)),        # vlens
            pl.BlockSpec((block_heads, Lq, D), lambda g: (g, 0, 0)),  # Q
            pl.BlockSpec((block_heads, Lk, D), lambda g: (g, 0, 0)),  # K
            pl.BlockSpec((block_heads, Lk, D), lambda g: (g, 0, 0)),  # V
        ],
        out_specs=pl.BlockSpec((block_heads, Lq, D), lambda g: (g, 0, 0)),
    )

    return pl.pallas_call(
        functools.partial(_attn_kernel, masked=masked),
        out_shape=jax.ShapeDtypeStruct((BH, Lq, D), queries.dtype),
        grid_spec=grid_spec,
        compiler_params=pltpu.CompilerParams(
            dimension_semantics=("parallel",),
            vmem_limit_bytes=vmem_limit),
        cost_estimate=cost,
    )(vl_per_head, queries, keys, values)


def dot_product_attention_module(queries, keys, values, valid_lens):
    """Wrapper matching DotPructAttention.forward.

    valid_lens: None, [batch] (per-batch) or [batch, q_seq_len] (per-query).
    """
    BH, Lq, D = queries.shape
    Lk = keys.shape[1]
    if valid_lens is None:
        vl_per_head = jnp.full((BH, Lq), Lk, dtype=jnp.int32)
        masked = False
    else:
        B = valid_lens.shape[0]
        H = BH // B
        assert H * B == BH, "valid_lens batch must divide batch*heads"
        if valid_lens.ndim == 1:
            vl_bq = jnp.broadcast_to(valid_lens[:, None], (B, Lq))
        else:                          # [B, Lq] per-query valid lengths
            vl_bq = valid_lens
        # repeat_interleave over heads: rows b*H + h share batch b's lengths.
        vl_per_head = jnp.repeat(vl_bq, H, axis=0).astype(jnp.int32)
        masked = True
    block_heads = _pick_block_heads(BH, Lq, Lk, D, queries.dtype)
    return _dot_product_attention(vl_per_head, queries, keys, values,
                                  block_heads=block_heads, masked=masked)


def _reference(queries, keys, values, valid_lens):
    """Pure-JAX reference mirroring the PyTorch module (incl. 2-D lens)."""
    BH, Lq, D = queries.shape
    Lk = keys.shape[1]
    scores = jnp.einsum("bqd,bkd->bqk", queries, keys) / math.sqrt(D)
    if valid_lens is not None:
        B = valid_lens.shape[0]
        H = BH // B
        if valid_lens.ndim == 1:
            vl = jnp.broadcast_to(valid_lens[:, None], (B, Lq))
        else:
            vl = valid_lens
        vl = jnp.repeat(vl, H, axis=0)                       # [BH, Lq]
        mask = jnp.arange(Lk)[None, None, :] >= vl[:, :, None]
        scores = jnp.where(mask, -1000000.0, scores)
    p = jax.nn.softmax(scores, axis=2)
    return jnp.einsum("bqk,bkd->bqd", p, values)


if __name__ == "__main__":
    key = jax.random.PRNGKey(0)
    B, H, Lq, Lk, D = 2, 4, 8, 8, 32
    BH = B * H
    kq, kk, kv = jax.random.split(key, 3)
    queries = jax.random.normal(kq, (BH, Lq, D), dtype=jnp.float32)
    keys = jax.random.normal(kk, (BH, Lk, D), dtype=jnp.float32)
    values = jax.random.normal(kv, (BH, Lk, D), dtype=jnp.float32)

    # Tolerance covers backend default matmul-precision differences between
    # the Pallas MXU path and the XLA reference; kernel math itself is f32
    # with an exact softmax division.
    TOL = 2e-2

    # 1-D (per-batch) valid_lens
    valid_lens_1d = jnp.array([3, 6], dtype=jnp.int32)
    out = jax.block_until_ready(
        dot_product_attention_module(queries, keys, values, valid_lens_1d))
    ref = _reference(queries, keys, values, valid_lens_1d)
    assert out.shape == (BH, Lq, D)
    assert jnp.max(jnp.abs(out - ref)) < TOL, "mismatch (1-D valid_lens)"

    # 2-D (per-query) valid_lens
    valid_lens_2d = jnp.array([[1, 2, 3, 4, 5, 6, 7, 8],
                               [8, 7, 6, 5, 4, 3, 2, 1]], dtype=jnp.int32)
    out2 = jax.block_until_ready(
        dot_product_attention_module(queries, keys, values, valid_lens_2d))
    ref2 = _reference(queries, keys, values, valid_lens_2d)
    assert jnp.max(jnp.abs(out2 - ref2)) < TOL, "mismatch (2-D valid_lens)"

    # no-mask path
    out3 = jax.block_until_ready(
        dot_product_attention_module(queries, keys, values, None))
    ref3 = _reference(queries, keys, values, None)
    assert jnp.max(jnp.abs(out3 - ref3)) < TOL, "mismatch (no mask)"

    print("KERNEL_OK")
</pallas_src>

<mosaic_0001>
module attributes {stable_mosaic.version = 11 : i64} {
  func.func @_attn_kernel(%arg0: i32, %arg1: memref<8x8xi32, #tpu.memory_space<vmem>>, %arg2: memref<8x8x32xf32, #tpu.memory_space<vmem>>, %arg3: memref<8x8x32xf32, #tpu.memory_space<vmem>>, %arg4: memref<8x8x32xf32, #tpu.memory_space<vmem>>, %arg5: memref<8x8x32xf32, #tpu.memory_space<vmem>>) attributes {dimension_semantics = [#tpu.dimension_semantics<parallel>], iteration_bounds = array<i64: 1>, scalar_prefetch = 0 : i64, scratch_operands = 0 : i64, tpu.core_type = #tpu.core_type<tc>, window_params = [{transform_indices = @transform_0, window_bounds = array<i64: 8, 8>}, {transform_indices = @transform_1, window_bounds = array<i64: 8, 8, 32>}, {transform_indices = @transform_2, window_bounds = array<i64: 8, 8, 32>}, {transform_indices = @transform_3, window_bounds = array<i64: 8, 8, 32>}, {transform_indices = @transform_4, window_bounds = array<i64: 8, 8, 32>}]} {
    %c0 = arith.constant 0 : index
    %c0_0 = arith.constant 0 : index
    %c0_1 = arith.constant 0 : index
    %0 = vector.load %arg2[%c0, %c0_0, %c0_1] : memref<8x8x32xf32, #tpu.memory_space<vmem>>, vector<8x8x32xf32>
    %c0_2 = arith.constant 0 : index
    %c0_3 = arith.constant 0 : index
    %c0_4 = arith.constant 0 : index
    %1 = vector.load %arg3[%c0_2, %c0_3, %c0_4] : memref<8x8x32xf32, #tpu.memory_space<vmem>>, vector<8x8x32xf32>
    %c0_5 = arith.constant 0 : index
    %c0_6 = arith.constant 0 : index
    %c0_7 = arith.constant 0 : index
    %2 = vector.load %arg4[%c0_5, %c0_6, %c0_7] : memref<8x8x32xf32, #tpu.memory_space<vmem>>, vector<8x8x32xf32>
    %cst = arith.constant 0.176776692 : f32
    %3 = vector.broadcast %cst : f32 to vector<8x8x32xf32>
    %4 = arith.mulf %0, %3 : vector<8x8x32xf32>
    "tpu.trace_start"() <{level = 10 : i32, message = "hqd,hkd->hqk"}> : () -> ()
    %cst_8 = arith.constant dense<0.000000e+00> : vector<8x8x8xf32>
    %5 = tpu.matmul %4, %1, %cst_8 {dimension_numbers = #tpu.dot_dimension_numbers<[2], [2], [1], [1], [0, 0, 0, 1, 1, 1], [0], [0]>} : vector<8x8x32xf32>, vector<8x8x32xf32>, vector<8x8x8xf32> -> vector<8x8x8xf32>
    "tpu.trace_stop"() : () -> ()
    %c0_9 = arith.constant 0 : index
    %c0_10 = arith.constant 0 : index
    %6 = vector.load %arg1[%c0_9, %c0_10] : memref<8x8xi32, #tpu.memory_space<vmem>>, vector<8x8xi32>
    %7 = tpu.iota {dimensions = array<i32: 2>} : vector<8x8x8xi32>
    %8 = vector.shape_cast %6 : vector<8x8xi32> to vector<8x8x1xi32>
    %9 = vector.broadcast %8 : vector<8x8x1xi32> to vector<8x8x8xi32>
    %10 = arith.cmpi sge, %7, %9 : vector<8x8x8xi32>
    %cst_11 = arith.constant -1.000000e+06 : f32
    %11 = vector.broadcast %cst_11 : f32 to vector<8x8x8xf32>
    %12 = arith.select %10, %11, %5 : vector<8x8x8xi1>, vector<8x8x8xf32>
    %cst_12 = arith.constant dense<0xFF800000> : vector<8x8xf32>
    %13 = vector.multi_reduction <maximumf>, %12, %cst_12 [2] : vector<8x8x8xf32> to vector<8x8xf32>
    %14 = vector.shape_cast %13 : vector<8x8xf32> to vector<8x8x1xf32>
    %15 = vector.broadcast %14 : vector<8x8x1xf32> to vector<8x8x8xf32>
    %16 = arith.subf %12, %15 : vector<8x8x8xf32>
    %17 = math.exp %16 : vector<8x8x8xf32>
    %cst_13 = arith.constant dense<0.000000e+00> : vector<8x8xf32>
    %18 = vector.multi_reduction <add>, %17, %cst_13 [2] : vector<8x8x8xf32> to vector<8x8xf32>
    %19 = vector.shape_cast %18 : vector<8x8xf32> to vector<8x8x1xf32>
    %20 = vector.broadcast %19 : vector<8x8x1xf32> to vector<8x8x8xf32>
    %21 = arith.divf %17, %20 : vector<8x8x8xf32>
    "tpu.trace_start"() <{level = 10 : i32, message = "hqk,hkd->hqd"}> : () -> ()
    %cst_14 = arith.constant dense<0.000000e+00> : vector<8x8x32xf32>
    %22 = tpu.matmul %21, %2, %cst_14 {dimension_numbers = #tpu.dot_dimension_numbers<[2], [1], [1], [2], [0, 0, 0, 1, 1, 2], [0], [0]>} : vector<8x8x8xf32>, vector<8x8x32xf32>, vector<8x8x32xf32> -> vector<8x8x32xf32>
    "tpu.trace_stop"() : () -> ()
    %c0_15 = arith.constant 0 : index
    %c0_16 = arith.constant 0 : index
    %c0_17 = arith.constant 0 : index
    %23 = vector.load %arg5[%c0_15, %c0_16, %c0_17] : memref<8x8x32xf32, #tpu.memory_space<vmem>>, vector<8x8x32xf32>
    tpu.vector_store %arg5[%c0_15, %c0_16, %c0_17], %22 {strides = array<i32>} : memref<8x8x32xf32, #tpu.memory_space<vmem>>, vector<8x8x32xf32>,
    return
  }
  func.func @transform_0(%arg0: i32) -> (i32, i32) {
    %c0_i32 = arith.constant 0 : i32
    %c0_i32_0 = arith.constant 0 : i32
    return %arg0, %c0_i32 : i32, i32
  }
  func.func @transform_1(%arg0: i32) -> (i32, i32, i32) {
    %c0_i32 = arith.constant 0 : i32
    %c0_i32_0 = arith.constant 0 : i32
    %c0_i32_1 = arith.constant 0 : i32
    return %arg0, %c0_i32, %c0_i32_0 : i32, i32, i32
  }
  func.func @transform_2(%arg0: i32) -> (i32, i32, i32) {
    %c0_i32 = arith.constant 0 : i32
    %c0_i32_0 = arith.constant 0 : i32
    %c0_i32_1 = arith.constant 0 : i32
    return %arg0, %c0_i32, %c0_i32_0 : i32, i32, i32
  }
  func.func @transform_3(%arg0: i32) -> (i32, i32, i32) {
    %c0_i32 = arith.constant 0 : i32
    %c0_i32_0 = arith.constant 0 : i32
    %c0_i32_1 = arith.constant 0 : i32
    return %arg0, %c0_i32, %c0_i32_0 : i32, i32, i32
  }
  func.func @transform_4(%arg0: i32) -> (i32, i32, i32) {
    %c0_i32 = arith.constant 0 : i32
    %c0_i32_0 = arith.constant 0 : i32
    %c0_i32_1 = arith.constant 0 : i32
    return %arg0, %c0_i32, %c0_i32_0 : i32, i32, i32
  }
}

</mosaic_0001>

<bundles_post_ra>
// kernel: _dot_product_attention.1
= control target key start
LH: loop header
LB: loop body
LE: loop exit
PB: predicated region body
PF: predicated region fallthrough
CT: control target
= control target key end

     0   :  { %9 = vsyncpa [#allocation3], 0  ;;  %s1207_s0 = inlined_call_operand.hbm [shape: s32[8,8], index: 0, kind: input, shape index: {}]   ;;  %s1208_s1 = inlined_call_operand.hbm [shape: f32[8,8,32], index: 1, kind: input, shape index: {}]   ;;  %s1209_s2 = inlined_call_operand.hbm [shape: f32[8,8,32], index: 2, kind: input, shape index: {}]   ;;  %s1210_s3 = inlined_call_operand.hbm [shape: f32[8,8,32], index: 3, kind: input, shape index: {}]   ;;  %s1211_s4 = inlined_call_operand.hbm [shape: f32[8,8,32], index: 4, kind: output, shape index: {}]  }
   0x1   :  { %10 = vsyncpa [#allocation6], 0 }
   0x2   :  { %11 = vsyncpa [#allocation9], 0  ;;  %s28_s17 = sshll.u32 %s1208_s1, 4  ;;  %s29_s17 = int_to_ptr.hbm [resolvable:$true] %s28_s17 }
   0x3   :  { %12 = vsyncpa [#allocation4], 0  ;;  %s995_s18 = smov [#allocation5]   ;;  %s18_s22 = sshll.u32 %s1207_s0, 4  ;;  %s19_s22 = int_to_ptr.hbm [resolvable:$true] %s18_s22 }
   0x4   :  { %s30_s19 = sshll.u32 %s995_s18, 4  ;;  %s996_s23 = smov 128   ;;  %s31_s19 = int_to_ptr.vmem [resolvable:$true] %s30_s19 }
   0x5   :  { %s997_s24 = smov 8   ;;  %s998_s25 = smov [#allocation2]  }
   0x6   :  { %36 = dma.hbm_to_vmem [thread:$0]  %s29_s17, 1024, %s31_s19, [#allocation6], %s996_s23, %s996_s23, %s997_s24  }
   0x7   :  { %s20_s26 = sshll.u32 %s998_s25, 4  ;;  %s41_s28 = sshll.u32 %s1209_s2, 4  ;;  %s21_s26 = int_to_ptr.vmem [resolvable:$true] %s20_s26  ;;  %s42_s28 = int_to_ptr.hbm [resolvable:$true] %s41_s28 }
   0x8   :  { %23 = dma.hbm_to_vmem [thread:$0]  %s19_s22, 128, %s21_s26, [#allocation3]  }
   0x9   :  { %s54_s0 = sshll.u32 %s1210_s3, 4  ;;  %s999_s5 = smov [#allocation7]   ;;  %s55_s0 = int_to_ptr.hbm [resolvable:$true] %s54_s0 }
   0xa   :  { %s43_s6 = sshll.u32 %s999_s5, 4  ;;  %s1000_s7 = smov [#allocation8]   ;;  %s44_s6 = int_to_ptr.vmem [resolvable:$true] %s43_s6 }
   0xb   :  { %49 = dma.hbm_to_vmem [thread:$0]  %s42_s28, 1024, %s44_s6, [#allocation6], %s996_s23, %s996_s23, %s997_s24  }
   0xc   :  { %s56_s8 = sshll.u32 %s1000_s7, 4  ;;  %s57_s8 = int_to_ptr.vmem [resolvable:$true] %s56_s8 }
   0xd   :  { %62 = dma.hbm_to_vmem [thread:$0]  %s55_s0, 1024, %s57_s8, [#allocation9], %s996_s23, %s996_s23, %s997_s24  }
   0xe   :  { %987 = dma.done.wait [#allocation3], 128  }
   0xf   :  { %988 = vsyncadd [#allocation3], 4294967168 }
  0x10   :  { %989 = dma.done.wait [#allocation6], 2048  }
  0x11   :  { %990 = vsyncadd [#allocation6], 4294965248 }
  0x12   :  { %991 = dma.done.wait [#allocation9], 1024  }
  0x13   :  { %992 = vsyncadd [#allocation9], 4294966272  ;;  %v321_v0 = vlaneseq  ;;  %vm111_vm0 = vcmask 261120   ;;  %v87_v2 = vld [vmem:[#allocation7] sm:$0xff]  ;;  %v88_v3 = vld [vmem:[#allocation7 + $0x8] sm:$0xff]  ;;  %vm395_vm1 = vcmask 64512  }
  0x14   :  { %v89_v4 = vld [vmem:[#allocation7 + $0x10] sm:$0xff]  ;;  %801 = vmatpush.xpose.msk.msra.mxu0 %vm111_vm0, %v87_v2  ;;  %803 = vmatpush.xpose.msk.msra.mxu1 %vm111_vm0, %v88_v3  ;;  %v90_v5 = vld [vmem:[#allocation7 + $0x18] sm:$0xff]  ;;  %v79_v6 = vld [vmem:[#allocation5] sm:$0xff]  ;;  %s1001_s2 = smov [#allocation10]   ;;  %s786_s11 = sshll.u32 %s1211_s4, 4  ;;  %s787_s11 = int_to_ptr.hbm [resolvable:$true] %s786_s11 }
  0x15   :  { %v325_v1 = vshrl.u32 %v321_v0, 7  ;;  %v80_v7 = vld [vmem:[#allocation5 + $0x8] sm:$0xff]  ;;  %805 = vmatpush.xpose.msk.msra.mxu2 %vm111_vm0, %v89_v4  ;;  %807 = vmatpush.xpose.msk.msra.mxu3 %vm111_vm0, %v90_v5  ;;  %v103_v8 = vmul.f32 0.17677669, %v79_v6  ;;  %v81_v10 = vld [vmem:[#allocation5 + $0x10] sm:$0xff]  ;;  %v82_v11 = vld [vmem:[#allocation5 + $0x18] sm:$0xff] }
  0x16   :  { %v104_v9 = vmul.f32 0.17677669, %v80_v7  ;;  %v105_v12 = vmul.f32 0.17677669, %v81_v10  ;;  %v106_v13 = vmul.f32 0.17677669, %v82_v11 }
  0x17   :  { %833 = vset.pattern.permute.xlu1 %v325_v1  ;;  %832 = vset.pattern.permute.xlu0 %v325_v1  ;;  %v320_v14 = vld [vmem:[#allocation2] sm:$0xff]  ;;  %v93_v17 = vld [vmem:[#allocation7 + $0x30] sm:$0xff]  ;;  %v91_v19 = vld [vmem:[#allocation7 + $0x20] sm:$0xff]  ;;  %v322_v37 = vand.u32 127, %v321_v0  ;;  %s784_s3 = sshll.u32 %s1001_s2, 4  ;;  %s785_s3 = int_to_ptr.vmem [resolvable:$true] %s784_s3 }
  0x18   :  { %834 = vset.pattern.permute.xlu2 %v325_v1  ;;  %802 = vmatmul.msk.f32.vlgmr.msra.gmra.mxu0 %vm111_vm0, %v103_v8  ;;  %v337_v15 = vperm.slane %v320_v14, 2  ;;  %v323_v16 = vperm.slane %v320_v14, 0  ;;  %v94_v18 = vld [vmem:[#allocation7 + $0x38] sm:$0xff]  ;;  %v92_v20 = vld [vmem:[#allocation7 + $0x28] sm:$0xff]  ;;  %v83_v21 = vld [vmem:[#allocation5 + $0x20] sm:$0xff]  ;;  %v365_v25 = vperm.slane %v320_v14, 6 }
  0x19   :  { %804 = vmatmul.msk.f32.vlgmr.msra.gmra.mxu1 %vm111_vm0, %v104_v9  ;;  %806 = vmatmul.msk.f32.vlgmr.msra.gmra.mxu2 %vm111_vm0, %v105_v12  ;;  %v84_v22 = vld [vmem:[#allocation5 + $0x28] sm:$0xff]  ;;  %v85_v23 = vld [vmem:[#allocation5 + $0x30] sm:$0xff]  ;;  %v86_v24 = vld [vmem:[#allocation5 + $0x38] sm:$0xff]  ;;  %v107_v26 = vmul.f32 0.17677669, %v83_v21  ;;  %v344_v30 = vperm.slane %v320_v14, 3 }
  0x1a   :  { %808 = vmatmul.msk.f32.vlgmr.msra.gmra.mxu3 %vm111_vm0, %v106_v13  ;;  %813 = vmatpush.xpose.msk.msrb.mxu2 %vm111_vm0, %v93_v17  ;;  %v108_v27 = vmul.f32 0.17677669, %v84_v22  ;;  %v109_v28 = vmul.f32 0.17677669, %v85_v23  ;;  %v110_v29 = vmul.f32 0.17677669, %v86_v24 }
  0x1b   :  { %815 = vmatpush.xpose.msk.msrb.mxu3 %vm111_vm0, %v94_v18  ;;  %809 = vmatpush.xpose.msk.msrb.mxu0 %vm111_vm0, %v91_v19  ;;  %v330_v31 = vperm.slane %v320_v14, 1  ;;  %v372_v32 = vperm.slane %v320_v14, 7  ;;  %v351_v33 = vperm.slane %v320_v14, 4  ;;  %v358_v34 = vperm.slane %v320_v14, 5 }
  0x1c   :  { %811 = vmatpush.xpose.msk.msrb.mxu1 %vm111_vm0, %v92_v20 }
  0x1f   :  { %342 = vperm.xlu0 %832, %v337_v15   ;;  %328 = vperm.xlu1 %833, %v323_v16  }
  0x20   :  { %370 = vperm.xlu2 %834, %v365_v25   ;;  %810 = vmatmul.msk.f32.vlgmr.msrb.gmra.mxu0 %vm111_vm0, %v107_v26 }
  0x21   :  { %812 = vmatmul.msk.f32.vlgmr.msrb.gmra.mxu1 %vm111_vm0, %v108_v27  ;;  %814 = vmatmul.msk.f32.vlgmr.msrb.gmra.mxu2 %vm111_vm0, %v109_v28 }
  0x22   :  { %816 = vmatmul.msk.f32.vlgmr.msrb.gmra.mxu3 %vm111_vm0, %v110_v29 }
  0x27   :  { %349 = vperm.xlu0 %832, %v344_v30   ;;  %335 = vperm.xlu1 %833, %v330_v31  }
  0x28   :  { %377 = vperm.xlu2 %834, %v372_v32  }
  0x2f   :  { %356 = vperm.xlu0 %832, %v351_v33   ;;  %363 = vperm.xlu1 %833, %v358_v34  }
  0x7a   :  { %v371_v46 = vpop.permute.xlu2 %370 }
  0x7b   :  { %vm385_vm7 = vcmp.ge.s32.totalorder %v322_v37, %v371_v46  ;;  %v97_v46 = vld [vmem:[#allocation8 + $0x10] sm:$0xff] }
  0x7c   :  { %652 = vmatpush.msra.mxu2 %v97_v46 }
  0x82   :  { %v378_v57 = vpop.permute.xlu2 %377 }
  0x83   :  { %vm386_vm8 = vcmp.ge.s32.totalorder %v322_v37, %v378_v57 }
  0x91   :  { %v343_v35 = vpop.permute.xlu0 %342  ;;  %v329_v36 = vpop.permute.xlu1 %328 }
  0x92   :  { %vm379_vm2 = vcmp.ge.s32.totalorder %v322_v37, %v329_v36  ;;  %vm381_vm4 = vcmp.ge.s32.totalorder %v322_v37, %v343_v35 }
  0x95   :  { %v135_v40 = vpop.f32.mrf.mxu0 }
  0x96   :  { %v161_v41 = vpop.f32.mrf.mxu1  ;;  %v387_v42 = vsel %vm379_vm2, -1000000.0, %v135_v40 }
  0x97   :  { %v396_v45 = vsel %vm395_vm1, %v387_v42, -inf }
  0x98   :  { %397 = vmax.xlane.f32.xlu1 %v396_v45  ;;  %v98_v45 = vld [vmem:[#allocation8 + $0x18] sm:$0xff] }
  0x99   :  { %v350_v38 = vpop.permute.xlu0 %349  ;;  %v336_v39 = vpop.permute.xlu1 %335  ;;  %675 = vmatpush.msra.mxu3 %v98_v45 }
  0x9a   :  { %vm380_vm3 = vcmp.ge.s32.totalorder %v322_v37, %v336_v39  ;;  %vm382_vm5 = vcmp.ge.s32.totalorder %v322_v37, %v350_v38 }
  0x9b   :  { %v388_v43 = vsel %vm380_vm3, -1000000.0, %v161_v41 }
  0x9c   :  { %v399_v44 = vsel %vm395_vm1, %v388_v43, -inf  ;;  %v187_v48 = vpop.f32.mrf.mxu2 }
  0x9d   :  { %400 = vmax.xlane.f32.xlu2 %v399_v44  ;;  %v213_v49 = vpop.f32.mrf.mxu3  ;;  %v389_v50 = vsel %vm381_vm4, -1000000.0, %v187_v48  ;;  %v239_v52 = vpop.f32.mrf.mxu0  ;;  %v95_v44 = vld [vmem:[#allocation8] sm:$0xff]  ;;  %v102_v48 = vld [vmem:[#allocation8 + $0x38] sm:$0xff] }
  0x9e   :  { %v390_v51 = vsel %vm382_vm5, -1000000.0, %v213_v49  ;;  %v402_v55 = vsel %vm395_vm1, %v389_v50, -inf  ;;  %v265_v1 = vpop.f32.mrf.mxu1  ;;  %606 = vmatpush.msra.mxu0 %v95_v44  ;;  %767 = vmatpush.msrb.mxu3 %v102_v48 }
  0x9f   :  { %v405_v54 = vsel %vm395_vm1, %v390_v51, -inf }
  0xa0   :  { %406 = vmax.xlane.f32.xlu0 %v405_v54  ;;  %v101_v54 = vld [vmem:[#allocation8 + $0x30] sm:$0xff] }
  0xa1   :  { %v357_v47 = vpop.permute.xlu0 %356  ;;  %v364_v60 = vpop.permute.xlu1 %363  ;;  %744 = vmatpush.msrb.mxu2 %v101_v54 }
  0xa2   :  { %vm383_vm6 = vcmp.ge.s32.totalorder %v322_v37, %v357_v47  ;;  %vm384_vm9 = vcmp.ge.s32.totalorder %v322_v37, %v364_v60  ;;  %v100_v60 = vld [vmem:[#allocation8 + $0x28] sm:$0xff] }
  0xa3   :  { %v391_v53 = vsel %vm383_vm6, -1000000.0, %v239_v52  ;;  %v392_v2 = vsel %vm384_vm9, -1000000.0, %v265_v1 }
  0xa4   :  { %v408_v56 = vsel %vm395_vm1, %v391_v53, -inf  ;;  %v291_v58 = vpop.f32.mrf.mxu2  ;;  %v411_v3 = vsel %vm395_vm1, %v392_v2, -inf }
  0xa5   :  { %403 = vmax.xlane.f32.xlu2 %v402_v55  ;;  %409 = vmax.xlane.f32.xlu1 %v408_v56  ;;  %v317_v59 = vpop.f32.mrf.mxu3  ;;  %v393_v61 = vsel %vm385_vm7, -1000000.0, %v291_v58 }
  0xa6   :  { %v394_v62 = vsel %vm386_vm8, -1000000.0, %v317_v59  ;;  %v414_v0 = vsel %vm395_vm1, %v393_v61, -inf  ;;  %v99_v59 = vld [vmem:[#allocation8 + $0x20] sm:$0xff] }
  0xa7   :  { %v417_v63 = vsel %vm395_vm1, %v394_v62, -inf  ;;  %698 = vmatpush.msrb.mxu0 %v99_v59 }
  0xa8   :  { %418 = vmax.xlane.f32.xlu0 %v417_v63 }
  0xad   :  { %415 = vmax.xlane.f32.xlu2 %v414_v0 }
  0xb5   :  { %412 = vmax.xlane.f32.xlu2 %v411_v3 }
 0x10b   :  { %v398_v5 = vpop.xlane.xlu1 %397 }
 0x10c   :  { %v420_v6 = vsub.f32 %v387_v42, %v398_v5 }
 0x10e   :  { %v428_v7 = vmul.f32 1.442695, %v420_v6 }
 0x110   :  { %v401_v4 = vpop.xlane.xlu2 %400  ;;  %835 = vpow2.f32 %v428_v7 }
 0x111   :  { %v421_v15 = vsub.f32 %v388_v43, %v401_v4 }
 0x113   :  { %v407_v8 = vpop.xlane.xlu0 %406  ;;  %v430_v17 = vmul.f32 1.442695, %v421_v15 }
 0x114   :  { %v423_v10 = vsub.f32 %v390_v51, %v407_v8 }
 0x116   :  { %v434_v12 = vmul.f32 1.442695, %v423_v10  ;;  %v1074_v14 = vpop.eup %835 }
 0x117   :  { %v444_v16 = vsel %vm395_vm1, %v1074_v14, 0.0 }
 0x118   :  { %v404_v9 = vpop.xlane.xlu2 %403  ;;  %837 = vpow2.f32 %v434_v12  ;;  %445 = vadd.xlane.f32.xlu2 %v444_v16  ;;  %v410_v20 = vpop.xlane.xlu1 %409 }
 0x119   :  { %v422_v11 = vsub.f32 %v389_v50, %v404_v9  ;;  %v424_v27 = vsub.f32 %v391_v53, %v410_v20  ;;  %v96_v53 = vld [vmem:[#allocation8 + $0x8] sm:$0xff] }
 0x11a   :  { %629 = vmatpush.msra.mxu1 %v96_v53 }
 0x11b   :  { %v432_v13 = vmul.f32 1.442695, %v422_v11  ;;  %v419_v18 = vpop.xlane.xlu0 %418  ;;  %v436_v30 = vmul.f32 1.442695, %v424_v27 }
 0x11c   :  { %v427_v21 = vsub.f32 %v394_v62, %v419_v18  ;;  %721 = vmatpush.msrb.mxu1 %v100_v60 }
 0x11d   :  { %839 = vpow2.f32 %v432_v13 }
 0x11e   :  { %v1078_v23 = vpop.eup %837  ;;  %v442_v24 = vmul.f32 1.442695, %v427_v21  ;;  %841 = vpow2.f32 %v430_v17 }
 0x11f   :  { %v453_v28 = vsel %vm395_vm1, %v1078_v23, 0.0 }
 0x120   :  { %v416_v19 = vpop.xlane.xlu2 %415  ;;  %843 = vpow2.f32 %v442_v24  ;;  %454 = vadd.xlane.f32.xlu1 %v453_v28 }
 0x121   :  { %v426_v22 = vsub.f32 %v393_v61, %v416_v19 }
 0x123   :  { %v440_v25 = vmul.f32 1.442695, %v426_v22  ;;  %v1080_v26 = vpop.eup %839 }
 0x124   :  { %v450_v29 = vsel %vm395_vm1, %v1080_v26, 0.0  ;;  %v1086_v33 = vpop.eup %841 }
 0x125   :  { %845 = vpow2.f32 %v440_v25  ;;  %451 = vadd.xlane.f32.xlu0 %v450_v29  ;;  %v447_v38 = vsel %vm395_vm1, %v1086_v33, 0.0 }
 0x126   :  { %v1088_v34 = vpop.eup %843  ;;  %847 = vpow2.f32 %v436_v30 }
 0x127   :  { %v465_v37 = vsel %vm395_vm1, %v1088_v34, 0.0 }
 0x128   :  { %v413_v31 = vpop.xlane.xlu2 %412  ;;  %466 = vadd.xlane.f32.xlu2 %v465_v37 }
 0x129   :  { %v425_v32 = vsub.f32 %v392_v2, %v413_v31 }
 0x12b   :  { %v438_v35 = vmul.f32 1.442695, %v425_v32  ;;  %v1090_v36 = vpop.eup %845 }
 0x12c   :  { %v462_v39 = vsel %vm395_vm1, %v1090_v36, 0.0  ;;  %v1098_v40 = vpop.eup %847 }
 0x12d   :  { %849 = vpow2.f32 %v438_v35  ;;  %448 = vadd.xlane.f32.xlu0 %v447_v38  ;;  %463 = vadd.xlane.f32.xlu1 %v462_v39  ;;  %v456_v43 = vsel %vm395_vm1, %v1098_v40, 0.0 }
 0x133   :  { %v1100_v41 = vpop.eup %849 }
 0x134   :  { %v459_v42 = vsel %vm395_vm1, %v1100_v41, 0.0 }
 0x135   :  { %460 = vadd.xlane.f32.xlu1 %v459_v42  ;;  %457 = vadd.xlane.f32.xlu0 %v456_v43 }
 0x18b   :  { %v446_v47 = vpop.xlane.xlu2 %445 }
 0x18c   :  { %851 = vrcp.f32 %v446_v47  ;;  %v477_v57 = vand.u32 2147483647, %v446_v47  ;;  %v479_v58 = vand.u32 2147483648, %v446_v47  ;;  %vm473_vm11 = vweird.f32 %v446_v47 }
 0x18e   :  { %vm478_vm13 = vcmp.eq.f32.partialorder %v477_v57, 8.507059e+37  ;;  %v480_v7 = vor.u32 1.1754944e-38, %v479_v58 }
 0x192   :  { %v852_v49 = vpop.eup %851 }
 0x193   :  { %v455_v50 = vpop.xlane.xlu1 %454  ;;  %v469_v51 = vmul.f32 %v852_v49, %v446_v47  ;;  %vm474_vm10 = vweird.f32 %v852_v49 }
 0x194   :  { %853 = vrcp.f32 %v455_v50  ;;  %vm1106_vm12 = vmor %vm473_vm11, %vm474_vm10  ;;  %v522_v9 = vand.u32 2147483647, %v455_v50  ;;  %v524_v10 = vand.u32 2147483648, %v455_v50  ;;  %vm518_vm2 = vweird.f32 %v455_v50 }
 0x195   :  { %v470_v55 = vsub.f32 1.0, %v469_v51 }
 0x196   :  { %vm1128_vm5 = vcmp.eq.f32.partialorder %v522_v9, 8.507059e+37  ;;  %v525_v27 = vor.u32 1.1754944e-38, %v524_v10 }
 0x197   :  { %v471_v56 = vmul.f32 %v852_v49, %v470_v55 }
 0x198   :  { %v452_v52 = vpop.xlane.xlu0 %451 }
 0x199   :  { %855 = vrcp.f32 %v452_v52  ;;  %v472_v62 = vadd.f32 %v852_v49, %v471_v56  ;;  %v507_v15 = vand.u32 2147483647, %v452_v52  ;;  %v509_v17 = vand.u32 2147483648, %v452_v52 }
 0x19a   :  { %v854_v61 = vpop.eup %853  ;;  %vm503_vm4 = vweird.f32 %v452_v52 }
 0x19b   :  { %v514_v1 = vmul.f32 %v854_v61, %v455_v50  ;;  %v1110_v2 = vpop.xlane.xlu2 %466  ;;  %v476_v3 = vsel %vm1106_vm12, %v852_v49, %v472_v62  ;;  %vm519_vm14 = vweird.f32 %v854_v61  ;;  %vm508_vm7 = vcmp.eq.f32.partialorder %v507_v15, 8.507059e+37 }
 0x19c   :  { %857 = vrcp.f32 %v1110_v2  ;;  %v481_v12 = vsel %vm478_vm13, %v480_v7, %v476_v3  ;;  %vm1121_vm3 = vmor %vm518_vm2, %vm519_vm14  ;;  %v584_v32 = vand.u32 2147483648, %v1110_v2  ;;  %vm578_vm8 = vweird.f32 %v1110_v2 }
 0x19d   :  { %v515_v8 = vsub.f32 1.0, %v514_v1  ;;  %v482_v22 = vmul.f32 %v1074_v14, %v481_v12  ;;  %v510_v14 = vor.u32 1.1754944e-38, %v509_v17  ;;  %v582_v38 = vand.u32 2147483647, %v1110_v2 }
 0x19e   :  { %v585_v49 = vor.u32 1.1754944e-38, %v584_v32 }
 0x19f   :  { %v856_v63 = vpop.eup %855  ;;  %v516_v13 = vmul.f32 %v854_v61, %v515_v8  ;;  %817 = vmatmul.msk.f32.vlgmr.msra.gmra.mxu0 %vm395_vm1, %v482_v22  ;;  %vm583_vm14 = vcmp.eq.f32.partialorder %v582_v38, 8.507059e+37 }
 0x1a0   :  { %v499_v4 = vmul.f32 %v856_v63, %v452_v52  ;;  %v1115_v5 = vpop.xlane.xlu0 %448  ;;  %v1117_v6 = vpop.xlane.xlu1 %463  ;;  %vm504_vm15 = vweird.f32 %v856_v63 }
 0x1a1   :  { %859 = vrcp.f32 %v1115_v5  ;;  %v517_v18 = vadd.f32 %v854_v61, %v516_v13  ;;  %vm1132_vm6 = vmor %vm503_vm4, %vm504_vm15  ;;  %vm488_vm10 = vweird.f32 %v1115_v5  ;;  %v492_v50 = vand.u32 2147483647, %v1115_v5 }
 0x1a2   :  { %v500_v11 = vsub.f32 1.0, %v499_v4  ;;  %861 = vrcp.f32 %v1117_v6  ;;  %v858_v19 = vpop.eup %857  ;;  %v494_v51 = vand.u32 2147483648, %v1115_v5  ;;  %v567_v56 = vand.u32 2147483647, %v1117_v6 }
 0x1a3   :  { %v521_v24 = vsel %vm1121_vm3, %v854_v61, %v517_v18  ;;  %v574_v29 = vmul.f32 %v858_v19, %v1110_v2  ;;  %vm579_vm9 = vweird.f32 %v858_v19  ;;  %v569_v57 = vand.u32 2147483648, %v1117_v6 }
 0x1a4   :  { %v501_v16 = vmul.f32 %v856_v63, %v500_v11  ;;  %v526_v44 = vsel %vm1128_vm5, %v525_v27, %v521_v24  ;;  %vm1159_vm12 = vmor %vm578_vm8, %vm579_vm9  ;;  %vm493_vm2 = vcmp.eq.f32.partialorder %v492_v50, 8.507059e+37  ;;  %v495_v0 = vor.u32 1.1754944e-38, %v494_v51 }
 0x1a5   :  { %v575_v37 = vsub.f32 1.0, %v574_v29  ;;  %v527_v58 = vmul.f32 %v1078_v23, %v526_v44  ;;  %vm563_vm3 = vweird.f32 %v1117_v6  ;;  %vm568_vm5 = vcmp.eq.f32.partialorder %v567_v56, 8.507059e+37 }
 0x1a6   :  { %v502_v21 = vadd.f32 %v856_v63, %v501_v16 }
 0x1a7   :  { %v860_v30 = vpop.eup %859  ;;  %v576_v46 = vmul.f32 %v858_v19, %v575_v37  ;;  %820 = vmatmul.msk.f32.vlgmr.msra.gmra.mxu3 %vm395_vm1, %v527_v58 }
 0x1a8   :  { %v506_v31 = vsel %vm1132_vm6, %v856_v63, %v502_v21  ;;  %v1141_v35 = vpop.xlane.xlu0 %457  ;;  %v484_v39 = vmul.f32 %v860_v30, %v1115_v5  ;;  %v1146_v42 = vpop.xlane.xlu1 %460  ;;  %vm489_vm11 = vweird.f32 %v860_v30  ;;  %v570_v5 = vor.u32 1.1754944e-38, %v569_v57 }
 0x1a9   :  { %v862_v43 = vpop.eup %861  ;;  %863 = vrcp.f32 %v1141_v35  ;;  %v511_v45 = vsel %vm508_vm7, %v510_v14, %v506_v31  ;;  %v577_v52 = vadd.f32 %v858_v19, %v576_v46  ;;  %vm490_vm15 = vmor %vm488_vm10, %vm489_vm11  ;;  %v537_v9 = vand.u32 2147483647, %v1141_v35 }
 0x1aa   :  { %v485_v47 = vsub.f32 1.0, %v484_v39  ;;  %v559_v48 = vmul.f32 %v862_v43, %v1117_v6  ;;  %865 = vrcp.f32 %v1146_v42  ;;  %v512_v59 = vmul.f32 %v1080_v26, %v511_v45 }
 0x1ab   :  { %v581_v60 = vsel %vm1159_vm12, %v858_v19, %v577_v52  ;;  %vm564_vm13 = vweird.f32 %v862_v43  ;;  %v539_v12 = vand.u32 2147483648, %v1141_v35  ;;  %vm533_vm7 = vweird.f32 %v1141_v35 }
 0x1ac   :  { %v486_v53 = vmul.f32 %v860_v30, %v485_v47  ;;  %v560_v54 = vsub.f32 1.0, %v559_v48  ;;  %819 = vmatmul.msk.f32.vlgmr.msra.gmra.mxu2 %vm395_vm1, %v512_v59  ;;  %v586_v23 = vsel %vm583_vm14, %v585_v49, %v581_v60  ;;  %vm565_vm4 = vmor %vm563_vm3, %vm564_vm13  ;;  %v554_v18 = vand.u32 2147483648, %v1146_v42 }
 0x1ad   :  { %v587_v10 = vmul.f32 %v1088_v34, %v586_v23  ;;  %v552_v34 = vand.u32 2147483647, %v1146_v42  ;;  %v540_v21 = vor.u32 1.1754944e-38, %v539_v12  ;;  %vm538_vm10 = vcmp.eq.f32.partialorder %v537_v9, 8.507059e+37 }
 0x1ae   :  { %v487_v61 = vadd.f32 %v860_v30, %v486_v53  ;;  %v561_v62 = vmul.f32 %v862_v43, %v560_v54  ;;  %vm548_vm11 = vweird.f32 %v1146_v42  ;;  %v555_v24 = vor.u32 1.1754944e-38, %v554_v18 }
 0x1af   :  { %v864_v63 = vpop.eup %863  ;;  %824 = vmatmul.msk.f32.vlgmr.msrb.gmra.mxu3 %vm395_vm1, %v587_v10  ;;  %vm553_vm13 = vcmp.eq.f32.partialorder %v552_v34, 8.507059e+37 }
 0x1b0   :  { %v491_v26 = vsel %vm490_vm15, %v860_v30, %v487_v61  ;;  %v562_v1 = vadd.f32 %v862_v43, %v561_v62  ;;  %v529_v2 = vmul.f32 %v864_v63, %v1141_v35  ;;  %v866_v3 = vpop.eup %865  ;;  %vm534_vm6 = vweird.f32 %v864_v63 }
 0x1b1   :  { %v496_v4 = vsel %vm493_vm2, %v495_v0, %v491_v26  ;;  %v544_v6 = vmul.f32 %v866_v3, %v1146_v42  ;;  %vm549_vm8 = vweird.f32 %v866_v3  ;;  %vm535_vm9 = vmor %vm533_vm7, %vm534_vm6 }
 0x1b2   :  { %v566_v7 = vsel %vm565_vm4, %v862_v43, %v562_v1  ;;  %v530_v8 = vsub.f32 1.0, %v529_v2  ;;  %v497_v13 = vmul.f32 %v1086_v33, %v496_v4  ;;  %vm550_vm12 = vmor %vm548_vm11, %vm549_vm8 }
 0x1b3   :  { %v571_v11 = vsel %vm568_vm5, %v570_v5, %v566_v7  ;;  %v545_v16 = vsub.f32 1.0, %v544_v6 }
 0x1b4   :  { %v531_v15 = vmul.f32 %v864_v63, %v530_v8  ;;  %v572_v17 = vmul.f32 %v1090_v36, %v571_v11  ;;  %818 = vmatmul.msk.f32.vlgmr.msra.gmra.mxu1 %vm395_vm1, %v497_v13 }
 0x1b5   :  { %v546_v20 = vmul.f32 %v866_v3, %v545_v16 }
 0x1b6   :  { %v532_v19 = vadd.f32 %v864_v63, %v531_v15  ;;  %823 = vmatmul.msk.f32.vlgmr.msrb.gmra.mxu2 %vm395_vm1, %v572_v17 }
 0x1b7   :  { %v547_v36 = vadd.f32 %v866_v3, %v546_v20 }
 0x1b8   :  { %v536_v33 = vsel %vm535_vm9, %v864_v63, %v532_v19 }
 0x1b9   :  { %v541_v22 = vsel %vm538_vm10, %v540_v21, %v536_v33  ;;  %v551_v27 = vsel %vm550_vm12, %v866_v3, %v547_v36 }
 0x1ba   :  { %v542_v25 = vmul.f32 %v1098_v40, %v541_v22  ;;  %v556_v28 = vsel %vm553_vm13, %v555_v24, %v551_v27 }
 0x1bb   :  { %v557_v29 = vmul.f32 %v1100_v41, %v556_v28 }
 0x1bc   :  { %821 = vmatmul.msk.f32.vlgmr.msrb.gmra.mxu0 %vm395_vm1, %v542_v25 }
 0x1bd   :  { %822 = vmatmul.msk.f32.vlgmr.msrb.gmra.mxu1 %vm395_vm1, %v557_v29 }
 0x21c   :  { %v608_v30 = vpop.f32.mrf.mxu0 }
 0x21d   :  { %772 = vst.msk [vmem:[#allocation10] sm:$0xff] %vm111_vm0, %v608_v30 }
 0x22a   :  { %v677_v31 = vpop.f32.mrf.mxu3 }
 0x22b   :  { %775 = vst.msk [vmem:[#allocation10 + $0x18] sm:$0xff] %vm111_vm0, %v677_v31 }
 0x22f   :  { %v654_v14 = vpop.f32.mrf.mxu2 }
 0x230   :  { %774 = vst.msk [vmem:[#allocation10 + $0x10] sm:$0xff] %vm111_vm0, %v654_v14 }
 0x231   :  { %v631_v32 = vpop.f32.mrf.mxu1 }
 0x232   :  { %773 = vst.msk [vmem:[#allocation10 + $0x8] sm:$0xff] %vm111_vm0, %v631_v32  ;;  %v769_v41 = vpop.f32.mrf.mxu3 }
 0x233   :  { %779 = vst.msk [vmem:[#allocation10 + $0x38] sm:$0xff] %vm111_vm0, %v769_v41 }
 0x239   :  { %v700_v40 = vpop.f32.mrf.mxu0  ;;  %v746_v35 = vpop.f32.mrf.mxu2 }
 0x23a   :  { %776 = vst.msk [vmem:[#allocation10 + $0x20] sm:$0xff] %vm111_vm0, %v700_v40  ;;  %v723_v37 = vpop.f32.mrf.mxu1 }
 0x23b   :  { %778 = vst.msk [vmem:[#allocation10 + $0x30] sm:$0xff] %vm111_vm0, %v746_v35 }
 0x23c   :  { %777 = vst.msk [vmem:[#allocation10 + $0x28] sm:$0xff] %vm111_vm0, %v723_v37 }
 0x23d   :  { %792 = dma.vmem_to_hbm [thread:$0]  %s785_s3, 1024, %s787_s11, [#allocation4], %s996_s23, %s996_s23, %s997_s24  }
 0x23e   :  { %993 = dma.done.wait [#allocation4], 1024  }
 0x23f   :  { %994 = vsyncadd [#allocation4], 4294966272 }
 0x240   :  { %797 = vsyncpa [#allocation3], 1 }
 0x241   :  { %798 = vsyncpa [#allocation6], 1 }
 0x242   :  { %799 = vsyncpa [#allocation9], 1 }
 0x243   :  { %800 = vsyncpa [#allocation4], 1 }

</bundles_post_ra>
